<compile_context>
chip_gen: v6e
topology: v6e:2x2x1
jax: 0.10.0
libtpu: 0.0.40
codegen_flags: <defaults>
</compile_context>

<pallas_src>
import functools

import jax
import jax.numpy as jnp
from jax import lax
from jax.experimental import pallas as pl
from jax.experimental.pallas import tpu as pltpu


def _round_up(a: int, b: int) -> int:
    return ((a + b - 1) // b) * b


def _sublane(dtype) -> int:
    # sublane packing: 8 for 4-byte, 16 for 2-byte, 32 for 1-byte dtypes
    return max(8, 32 // jnp.dtype(dtype).itemsize)


def _choose_tile(dim: int, cap: int, align: int = 128):
    """Largest multiple of `align` <= cap that divides round_up(dim, align)."""
    dim_p = _round_up(dim, align)
    t = min(dim_p, cap)
    t -= t % align
    while dim_p % t:
        t -= align
    return t, dim_p


# ---------------------------------------------------------------------------
# Reference GetSubnet (rank-based 0/1 mask) — used only for the checks below.
# ---------------------------------------------------------------------------
def get_subnet_ref(scores: jax.Array, k: float) -> jax.Array:
    """Replicates GetSubnet.forward: bottom (1-k) fraction -> 0, rest -> 1."""
    flat = scores.reshape(-1)
    idx = jnp.argsort(flat)                      # ascending, like torch.sort
    j = int((1.0 - k) * flat.size)
    mask_flat = jnp.zeros_like(flat)
    mask_flat = mask_flat.at[idx[j:]].set(1.0)   # top-k fraction -> 1
    return mask_flat.reshape(scores.shape)


# ---------------------------------------------------------------------------
# Pallas kernel: acc += x_tile @ (weight_tile masked by int8 mask).T
# ---------------------------------------------------------------------------
def subnet_linear_kernel(x_ref, w_ref, m_ref, b_ref, o_ref, acc_ref):
    kk = pl.program_id(2)

    @pl.when(kk == 0)
    def _():
        acc_ref[...] = jnp.zeros_like(acc_ref)

    # Mask the streamed weight tile with the pre-packed int8 mask (VPU work,
    # hidden under the MXU matmul).  Stays in the weight dtype.
    w = w_ref[...]
    w_masked = jnp.where(m_ref[...] != 0, w, jnp.zeros_like(w))

    # Contract the shared in_features axis directly (no transpose of w).
    acc_ref[...] += lax.dot_general(
        x_ref[...], w_masked,
        dimension_numbers=(((1,), (1,)), ((), ())),
        preferred_element_type=jnp.float32)

    @pl.when(kk == pl.num_programs(2) - 1)
    def _():
        y = acc_ref[...] + b_ref[...].astype(jnp.float32)   # bias only once
        o_ref[...] = y.astype(o_ref.dtype)


# ---------------------------------------------------------------------------
# Wrapper: top_k threshold -> int8 mask, tile selection, pallas_call.
# ---------------------------------------------------------------------------
@functools.partial(jax.jit, static_argnames=("top_k",))
def subnet_linear(x, weight, popup_scores, bias, top_k: float):
    """x: (B, in), weight/popup_scores: (out, in), bias: (out,) or None."""
    B, in_f = x.shape
    out_f, _ = weight.shape

    # --- rank threshold via lax.top_k (selection on the smaller side) ------
    # top_k is a static Python float (mirrors .item() in the PyTorch module).
    n = out_f * in_f
    j = int((1.0 - float(top_k)) * n)
    if j <= 0:                                   # keep everything
        mask = jnp.ones((out_f, in_f), jnp.int8)
    elif j >= n:                                 # drop everything
        mask = jnp.zeros((out_f, in_f), jnp.int8)
    else:
        abs_s = jnp.abs(popup_scores).reshape(-1)
        if (n - j) <= (j + 1):
            thr = jnp.min(lax.top_k(abs_s, n - j)[0])        # min of kept set
        else:
            thr = -jnp.min(lax.top_k(-abs_s, j + 1)[0])      # max of dropped set
        mask = (jnp.abs(popup_scores) >= thr).astype(jnp.int8)

    # --- tile sizes ---------------------------------------------------------
    sub = _sublane(x.dtype)
    tm = min(_round_up(B, sub), 512)
    tn, Np = _choose_tile(out_f, 512, 128)
    tk, Kp = _choose_tile(in_f, 1024, 128)
    Mp = _round_up(B, tm)

    # v7x has 2 TensorCores: make sure the parallel (i, j) grid has >=2 blocks.
    if (Mp // tm) * (Np // tn) == 1 and tn >= 256:
        half = (tn // 2 // 128) * 128
        while half >= 128 and Np % half:
            half -= 128
        if half >= 128:
            tn = half

    # --- pad only when required (no-op when dims are already aligned) ------
    xp = x if (Mp == B and Kp == in_f) else jnp.pad(x, ((0, Mp - B), (0, Kp - in_f)))
    need_wpad = (Np != out_f) or (Kp != in_f)
    wp = weight if not need_wpad else jnp.pad(weight, ((0, Np - out_f), (0, Kp - in_f)))
    mp = mask if not need_wpad else jnp.pad(mask, ((0, Np - out_f), (0, Kp - in_f)))
    b = bias if bias is not None else jnp.zeros((out_f,), weight.dtype)
    bp = (b if Np == out_f else jnp.pad(b, (0, Np - out_f))).reshape(1, Np)

    grid = (Mp // tm, Np // tn, Kp // tk)

    out = pl.pallas_call(
        subnet_linear_kernel,
        out_shape=jax.ShapeDtypeStruct((Mp, Np), x.dtype),
        grid_spec=pltpu.PrefetchScalarGridSpec(
            num_scalar_prefetch=0,
            grid=grid,
            in_specs=[
                pl.BlockSpec((tm, tk), lambda i, jj, kk: (i, kk)),    # x
                pl.BlockSpec((tn, tk), lambda i, jj, kk: (jj, kk)),   # weight
                pl.BlockSpec((tn, tk), lambda i, jj, kk: (jj, kk)),   # int8 mask
                pl.BlockSpec((1, tn), lambda i, jj, kk: (0, jj)),     # bias
            ],
            out_specs=pl.BlockSpec((tm, tn), lambda i, jj, kk: (i, jj)),
            scratch_shapes=[pltpu.VMEM((tm, tn), jnp.float32)],
        ),
        compiler_params=pltpu.CompilerParams(
            dimension_semantics=("parallel", "parallel", "arbitrary"),
            vmem_limit_bytes=32 * 1024 * 1024),
    )(xp, wp, mp, bp)

    return out[:B, :out_f]


if __name__ == "__main__":
    key = jax.random.PRNGKey(0)
    keys = jax.random.split(key, 12)

    # --- small test (module-like toy shapes) -------------------------------
    batch, in_features, out_features = 8, 32, 16
    x = jax.random.normal(keys[0], (batch, in_features), dtype=jnp.float32)
    weight = jax.random.normal(keys[1], (out_features, in_features), jnp.float32) * 0.1
    popup_scores = jax.random.normal(keys[2], (out_features, in_features), jnp.float32)
    bias = jax.random.normal(keys[3], (out_features,), jnp.float32) * 0.1

    for top_k in (1.0, 0.5):   # module default is 1.0; also exercise real masking
        y = jax.block_until_ready(subnet_linear(x, weight, popup_scores, bias, top_k))
        adj = get_subnet_ref(jnp.abs(popup_scores), top_k)
        y_ref = x @ (weight * adj).T + bias[None, :]
        assert jnp.allclose(y, y_ref, atol=1e-4, rtol=1e-5), f"mismatch (k={top_k})"

    # --- larger test: multi-tile K accumulation + multi-block N, no padding -
    B2, in2, out2 = 24, 2048, 256
    x2 = jax.random.normal(keys[4], (B2, in2), jnp.float32)
    w2 = jax.random.normal(keys[5], (out2, in2), jnp.float32) * 0.02
    s2 = jax.random.normal(keys[6], (out2, in2), jnp.float32)
    b2 = jax.random.normal(keys[7], (out2,), jnp.float32) * 0.1

    y2 = jax.block_until_ready(subnet_linear(x2, w2, s2, b2, 0.3))
    adj2 = get_subnet_ref(jnp.abs(s2), 0.3)
    y2_ref = x2 @ (w2 * adj2).T + b2[None, :]
    assert jnp.allclose(y2, y2_ref, atol=1e-3, rtol=1e-4), "mismatch (large, k=0.3)"

    # --- ragged test: exercises the padding fallback + no bias --------------
    B3, in3, out3 = 5, 100, 48
    x3 = jax.random.normal(keys[8], (B3, in3), jnp.float32)
    w3 = jax.random.normal(keys[9], (out3, in3), jnp.float32) * 0.1
    s3 = jax.random.normal(keys[10], (out3, in3), jnp.float32)

    y3 = jax.block_until_ready(subnet_linear(x3, w3, s3, None, 0.7))
    adj3 = get_subnet_ref(jnp.abs(s3), 0.7)
    y3_ref = x3 @ (w3 * adj3).T
    assert jnp.allclose(y3, y3_ref, atol=1e-4, rtol=1e-5), "mismatch (ragged, k=0.7)"

    print("KERNEL_OK")
</pallas_src>

<mosaic_0001>
module attributes {stable_mosaic.version = 11 : i64} {
  func.func @subnet_linear_kernel(%arg0: i32, %arg1: i32, %arg2: i32, %arg3: memref<8x128xf32, #tpu.memory_space<vmem>>, %arg4: memref<128x128xf32, #tpu.memory_space<vmem>>, %arg5: memref<128x128xi8, #tpu.memory_space<vmem>>, %arg6: memref<1x128xf32, #tpu.memory_space<vmem>>, %arg7: memref<8x128xf32, #tpu.memory_space<vmem>>, %arg8: memref<8x128xf32, #tpu.memory_space<vmem>>) attributes {dimension_semantics = [#tpu.dimension_semantics<parallel>, #tpu.dimension_semantics<parallel>, #tpu.dimension_semantics<arbitrary>], iteration_bounds = array<i64: 1, 1, 1>, scalar_prefetch = 0 : i64, scratch_operands = 1 : i64, tpu.core_type = #tpu.core_type<tc>, window_params = [{transform_indices = @transform_0, window_bounds = array<i64: 8, 128>}, {transform_indices = @transform_1, window_bounds = array<i64: 128, 128>}, {transform_indices = @transform_2, window_bounds = array<i64: 128, 128>}, {transform_indices = @transform_3, window_bounds = array<i64: 1, 128>}, {transform_indices = @transform_4, window_bounds = array<i64: 8, 128>}]} {
    %c0_i32 = arith.constant 0 : i32
    %0 = arith.cmpi eq, %arg2, %c0_i32 : i32
    %1 = arith.extui %0 : i1 to i32
    %c0_i32_0 = arith.constant 0 : i32
    %2 = arith.cmpi ne, %1, %c0_i32_0 : i32
    scf.if %2 {
      %cst_13 = arith.constant 0.000000e+00 : f32
      %17 = vector.broadcast %cst_13 : f32 to vector<8x128xf32>
      %c0_14 = arith.constant 0 : index
      %c0_15 = arith.constant 0 : index
      %18 = vector.load %arg8[%c0_14, %c0_15] : memref<8x128xf32, #tpu.memory_space<vmem>>, vector<8x128xf32>
      tpu.vector_store %arg8[%c0_14, %c0_15], %17 {strides = array<i32>} : memref<8x128xf32, #tpu.memory_space<vmem>>, vector<8x128xf32>,
    } else {
    }
    %c0 = arith.constant 0 : index
    %c0_1 = arith.constant 0 : index
    %3 = vector.load %arg4[%c0, %c0_1] : memref<128x128xf32, #tpu.memory_space<vmem>>, vector<128x128xf32>
    %c0_2 = arith.constant 0 : index
    %c0_3 = arith.constant 0 : index
    %4 = vector.load %arg5[%c0_2, %c0_3] : memref<128x128xi8, #tpu.memory_space<vmem>>, vector<128x128xi8>
    %c0_i8 = arith.constant 0 : i8
    %5 = vector.broadcast %c0_i8 : i8 to vector<128x128xi8>
    %6 = arith.cmpi ne, %4, %5 : vector<128x128xi8>
    %cst = arith.constant 0.000000e+00 : f32
    %7 = vector.broadcast %cst : f32 to vector<128x128xf32>
    %8 = arith.select %6, %3, %7 : vector<128x128xi1>, vector<128x128xf32>
    %c0_4 = arith.constant 0 : index
    %c0_5 = arith.constant 0 : index
    %9 = vector.load %arg8[%c0_4, %c0_5] : memref<8x128xf32, #tpu.memory_space<vmem>>, vector<8x128xf32>
    %c0_6 = arith.constant 0 : index
    %c0_7 = arith.constant 0 : index
    %10 = vector.load %arg3[%c0_6, %c0_7] : memref<8x128xf32, #tpu.memory_space<vmem>>, vector<8x128xf32>
    %cst_8 = arith.constant dense<0.000000e+00> : vector<8x128xf32>
    %11 = tpu.matmul %10, %8, %cst_8 {dimension_numbers = #tpu.dot_dimension_numbers<[1], [1], [0], [0], [0, 0, 1, 0], [], []>} : vector<8x128xf32>, vector<128x128xf32>, vector<8x128xf32> -> vector<8x128xf32>
    %12 = arith.addf %9, %11 : vector<8x128xf32>
    %c0_9 = arith.constant 0 : index
    %c0_10 = arith.constant 0 : index
    %13 = vector.load %arg8[%c0_9, %c0_10] : memref<8x128xf32, #tpu.memory_space<vmem>>, vector<8x128xf32>
    tpu.vector_store %arg8[%c0_9, %c0_10], %12 {strides = array<i32>} : memref<8x128xf32, #tpu.memory_space<vmem>>, vector<8x128xf32>,
    %c0_i32_11 = arith.constant 0 : i32
    %14 = arith.cmpi eq, %arg2, %c0_i32_11 : i32
    %15 = arith.extui %14 : i1 to i32
    %c0_i32_12 = arith.constant 0 : i32
    %16 = arith.cmpi ne, %15, %c0_i32_12 : i32
    scf.if %16 {
      %c0_13 = arith.constant 0 : index
      %c0_14 = arith.constant 0 : index
      %17 = vector.load %arg8[%c0_13, %c0_14] : memref<8x128xf32, #tpu.memory_space<vmem>>, vector<8x128xf32>
      %c0_15 = arith.constant 0 : index
      %c0_16 = arith.constant 0 : index
      %18 = vector.load %arg6[%c0_15, %c0_16] : memref<1x128xf32, #tpu.memory_space<vmem>>, vector<1x128xf32>
      %19 = vector.broadcast %18 : vector<1x128xf32> to vector<8x128xf32>
      %20 = arith.addf %17, %19 : vector<8x128xf32>
      %c0_17 = arith.constant 0 : index
      %c0_18 = arith.constant 0 : index
      %21 = vector.load %arg7[%c0_17, %c0_18] : memref<8x128xf32, #tpu.memory_space<vmem>>, vector<8x128xf32>
      tpu.vector_store %arg7[%c0_17, %c0_18], %20 {strides = array<i32>} : memref<8x128xf32, #tpu.memory_space<vmem>>, vector<8x128xf32>,
    } else {
    }
    return
  }
  func.func @transform_0(%arg0: i32, %arg1: i32, %arg2: i32) -> (i32, i32) {
    %c0_i32 = arith.constant 0 : i32
    return %arg0, %arg2 : i32, i32
  }
  func.func @transform_1(%arg0: i32, %arg1: i32, %arg2: i32) -> (i32, i32) {
    %c0_i32 = arith.constant 0 : i32
    return %arg1, %arg2 : i32, i32
  }
  func.func @transform_2(%arg0: i32, %arg1: i32, %arg2: i32) -> (i32, i32) {
    %c0_i32 = arith.constant 0 : i32
    return %arg1, %arg2 : i32, i32
  }
  func.func @transform_3(%arg0: i32, %arg1: i32, %arg2: i32) -> (i32, i32) {
    %c0_i32 = arith.constant 0 : i32
    %c0_i32_0 = arith.constant 0 : i32
    return %c0_i32, %arg1 : i32, i32
  }
  func.func @transform_4(%arg0: i32, %arg1: i32, %arg2: i32) -> (i32, i32) {
    %c0_i32 = arith.constant 0 : i32
    return %arg0, %arg1 : i32, i32
  }
}

</mosaic_0001>

<bundles_post_ra>
// kernel: subnet_linear.1
= control target key start
LH: loop header
LB: loop body
LE: loop exit
PB: predicated region body
PF: predicated region fallthrough
CT: control target
= control target key end

     0   :  { %v377_v1 = vmov 0.0   ;;  %vm378_vm1 = vmmov 0   ;;  %v379_v2 = vmov 0   ;;  %s512_s0 = inlined_call_operand.vmem [shape: f32[8,128], index: 0, kind: input, shape index: {}]   ;;  %s513_s1 = inlined_call_operand.vmem [shape: f32[128,128], index: 1, kind: input, shape index: {}]   ;;  %s514_s2 = inlined_call_operand.vmem [shape: s8[128,128], index: 2, kind: input, shape index: {}]   ;;  %s515_s3 = inlined_call_operand.vmem [shape: f32[1,128], index: 3, kind: input, shape index: {}]   ;;  %s516_s4 = inlined_call_operand.hbm [shape: f32[8,128], index: 4, kind: output, shape index: {}]  }
   0x1   :  { %v44_v0 = vld [vmem:[%s514_s2 + $0x18] sm:$0xff]  ;;  %316 = vmatprep.subr.mxu0 %v377_v1  ;;  %348 = vmatprep.mubr.msk.f32.mxu0 %vm378_vm1, %v377_v1  ;;  %v43_v4 = vld [vmem:[%s514_s2 + $0x10] sm:$0xff] }
   0x2   :  { %vm48_vm0 = vnez %v44_v0  ;;  %vm47_vm2 = vnez %v43_v4 }
   0x3   :  { %v52_v3 = vsel %vm48_vm0, 16843009, %v379_v2  ;;  %v51_v13 = vsel %vm47_vm2, 16843009, %v379_v2 }
   0x4   :  { %v68_v5 = vunpack.c.3.s8 %v52_v3  ;;  %v67_v6 = vunpack.c.2.s8 %v52_v3  ;;  %v66_v7 = vunpack.c.1.s8 %v52_v3  ;;  %v65_v8 = vunpack.c.0.s8 %v52_v3 }
   0x6   :  { %v99_v9 = vpack.c.b16 %v68_v5, %v68_v5  ;;  %v97_v10 = vpack.c.b16 %v67_v6, %v67_v6  ;;  %v95_v11 = vpack.c.b16 %v66_v7, %v66_v7  ;;  %v93_v12 = vpack.c.b16 %v65_v8, %v65_v8 }
   0x8   :  { %v100_v14 = vpack.c.b8 %v99_v9, %v99_v9  ;;  %v98_v15 = vpack.c.b8 %v97_v10, %v97_v10  ;;  %v96_v16 = vpack.c.b8 %v95_v11, %v95_v11 }
   0x9   :  { %9 = vsyncpa [#allocation4], 0  ;;  %v94_v17 = vpack.c.b8 %v93_v12, %v93_v12  ;;  %v64_v18 = vunpack.c.3.s8 %v51_v13  ;;  %v63_v19 = vunpack.c.2.s8 %v51_v13  ;;  %v40_v23 = vld [vmem:[%s513_s1 + $0x78] sm:$0xff]  ;;  %v62_v27 = vunpack.c.1.s8 %v51_v13  ;;  %v42_v28 = vld [vmem:[%s514_s2 + $0x8] sm:$0xff]  ;;  %s380_s6 = smov [#allocation3]  }
   0xa   :  { %vm116_vm3 = vnez %v100_v14  ;;  %vm115_vm4 = vnez %v98_v15  ;;  %vm114_vm5 = vnez %v96_v16  ;;  %v39_v31 = vld [vmem:[%s513_s1 + $0x70] sm:$0xff]  ;;  %vm46_vm9 = vnez %v42_v28  ;;  %v38_v38 = vld [vmem:[%s513_s1 + $0x68] sm:$0xff]  ;;  %v37_v44 = vld [vmem:[%s513_s1 + $0x60] sm:$0xff]  ;;  %s274_s7 = sshll.u32 %s380_s6, 4  ;;  %s275_s7 = int_to_ptr.vmem [resolvable:$true] %s274_s7 }
   0xb   :  { %v132_v20 = vsel %vm116_vm3, 16843009, %v379_v2  ;;  %v131_v21 = vsel %vm115_vm4, 16843009, %v379_v2  ;;  %v91_v22 = vpack.c.b16 %v64_v18, %v64_v18  ;;  %v130_v26 = vsel %vm114_vm5, 16843009, %v379_v2  ;;  %p360_p1 = scmp.lt.s32.totalorder %s275_s7, %s275_s7 }
   0xc   :  { %v148_v24 = vunpack.c.0.s8 %v132_v20  ;;  %v147_v25 = vunpack.c.0.s8 %v131_v21  ;;  %vm113_vm7 = vnez %v94_v17  ;;  %v89_v30 = vpack.c.b16 %v63_v19, %v63_v19  ;;  %v36_v50 = vld [vmem:[%s513_s1 + $0x58] sm:$0xff]  ;;  %v41_v53 = vld [vmem:[%s514_s2] sm:$0xff]  ;;  %v35_v57 = vld [vmem:[%s513_s1 + $0x50] sm:$0xff]  ;;  %s355_s8 = scalar_lea.vmem %s275_s7, 128 }
   0xd   :  { %v92_v29 = vpack.c.b8 %v91_v22, %v91_v22  ;;  %v146_v32 = vunpack.c.0.s8 %v130_v26  ;;  %v129_v33 = vsel %vm113_vm7, 16843009, %v379_v2  ;;  %v87_v35 = vpack.c.b16 %v62_v27, %v62_v27  ;;  %v34_v0 = vld [vmem:[%s513_s1 + $0x48] sm:$0xff]  ;;  %v33_v8 = vld [vmem:[%s513_s1 + $0x40] sm:$0xff]  ;;  %v32_v14 = vld [vmem:[%s513_s1 + $0x38] sm:$0xff]  ;;  %p356_p0 = scmp.ne.s32.totalorder %s275_s7, %s355_s8  ;;  %p361_p2 = scmp.lt.s32.totalorder %s355_s8, %s355_s8 }
   0xe   :  { %vm164_vm6 = vcmp.ne.s32.totalorder %v148_v24, 0  ;;  %vm163_vm8 = vcmp.ne.s32.totalorder %v147_v25, 0  ;;  %v90_v34 = vpack.c.b8 %v89_v30, %v89_v30  ;;  %v61_v36 = vunpack.c.0.s8 %v51_v13  ;;  %v31_v20 = vld [vmem:[%s513_s1 + $0x30] sm:$0xff]  ;;  %v30_v26 = vld [vmem:[%s513_s1 + $0x28] sm:$0xff] }
   0xf   :  { %317 = vmatpush3.xpose.msk.msra.mxu0 %vm164_vm6, %v40_v23  ;;  %vm112_vm10 = vnez %v92_v29  ;;  %v50_v37 = vsel %vm46_vm9, 16843009, %v379_v2  ;;  %vm162_vm11 = vcmp.ne.s32.totalorder %v146_v32, 0  ;;  %v145_v39 = vunpack.c.0.s8 %v129_v33  ;;  %p362_p3 = por %p361_p2, %p360_p1 }
  0x10   :  { %318 = vmatprep.subr.mxu0 %v377_v1  ;;  %v128_v40 = vsel %vm112_vm10, 16843009, %v379_v2  ;;  %vm111_vm12 = vnez %v90_v34  ;;  %v88_v41 = vpack.c.b8 %v87_v35, %v87_v35  ;;  %v85_v42 = vpack.c.b16 %v61_v36, %v61_v36  ;;  %v28_v35 = vld [vmem:[%s513_s1 + $0x18] sm:$0xff] }
  0x11   :  { %v60_v43 = vunpack.c.3.s8 %v50_v37  ;;  %vm161_vm13 = vcmp.ne.s32.totalorder %v145_v39, 0  ;;  %v144_v45 = vunpack.c.0.s8 %v128_v40  ;;  %v127_v46 = vsel %vm111_vm12, 16843009, %v379_v2  ;;  %p363_p4 = pnand %p362_p3, %p356_p0 }
  0x12   :  { %vm110_vm14 = vnez %v88_v41  ;;  %v86_v47 = vpack.c.b8 %v85_v42, %v85_v42  ;;  %v59_v49 = vunpack.c.2.s8 %v50_v37  ;;  %v143_v51 = vunpack.c.0.s8 %v127_v46  ;;  %v26_v41 = vld [vmem:[%s513_s1 + $0x8] sm:$0xff] }
  0x13   :  { %319 = vmatpush3.xpose.msk.msra.mxu0 %vm163_vm8, %v39_v31  ;;  %v83_v48 = vpack.c.b16 %v60_v43, %v60_v43  ;;  %vm160_vm15 = vcmp.ne.s32.totalorder %v144_v45, 0  ;;  %v126_v52 = vsel %vm110_vm14, 16843009, %v379_v2  ;;  %v58_v56 = vunpack.c.1.s8 %v50_v37  ;;  %v29_v31 = vld [vmem:[%s513_s1 + $0x20] sm:$0xff] }
  0x14   :  { %320 = vmatprep.subr.mxu0 %v377_v1  ;;  %vm109_vm0 = vnez %v86_v47  ;;  %v81_v55 = vpack.c.b16 %v59_v49, %v59_v49  ;;  %vm159_vm1 = vcmp.ne.s32.totalorder %v143_v51, 0  ;;  %v142_v58 = vunpack.c.0.s8 %v126_v52  ;;  %v25_v43 = vld [vmem:[%s513_s1] sm:$0xff] }
  0x15   :  { %v84_v54 = vpack.c.b8 %v83_v48, %v83_v48  ;;  %vm45_vm2 = vnez %v41_v53  ;;  %v125_v59 = vsel %vm109_vm0, 16843009, %v379_v2  ;;  %v79_v61 = vpack.c.b16 %v58_v56, %v58_v56 }
  0x16   :  { %v82_v60 = vpack.c.b8 %v81_v55, %v81_v55  ;;  %v57_v62 = vunpack.c.0.s8 %v50_v37  ;;  %v49_v63 = vsel %vm45_vm2, 16843009, %v379_v2  ;;  %vm158_vm4 = vcmp.ne.s32.totalorder %v142_v58, 0 }
  0x17   :  { %321 = vmatpush3.xpose.msk.msra.mxu0 %vm162_vm11, %v38_v38  ;;  %vm108_vm3 = vnez %v84_v54  ;;  %v141_v3 = vunpack.c.0.s8 %v125_v59  ;;  %v80_v5 = vpack.c.b8 %v79_v61, %v79_v61  ;;  %v56_v7 = vunpack.c.3.s8 %v49_v63  ;;  %v27_v38 = vld [vmem:[%s513_s1 + $0x10] sm:$0xff] }
  0x18   :  { %322 = vmatprep.subr.mxu0 %v377_v1  ;;  %v124_v4 = vsel %vm108_vm3, 16843009, %v379_v2  ;;  %vm107_vm5 = vnez %v82_v60  ;;  %v77_v6 = vpack.c.b16 %v57_v62, %v57_v62  ;;  %v55_v13 = vunpack.c.2.s8 %v49_v63 }
  0x19   :  { %vm157_vm6 = vcmp.ne.s32.totalorder %v141_v3, 0  ;;  %v140_v9 = vunpack.c.0.s8 %v124_v4  ;;  %v123_v10 = vsel %vm107_vm5, 16843009, %v379_v2  ;;  %vm106_vm7 = vnez %v80_v5 }
  0x1a   :  { %v78_v11 = vpack.c.b8 %v77_v6, %v77_v6  ;;  %v75_v12 = vpack.c.b16 %v56_v7, %v56_v7  ;;  %v139_v15 = vunpack.c.0.s8 %v123_v10  ;;  %v122_v16 = vsel %vm106_vm7, 16843009, %v379_v2 }
  0x1b   :  { %323 = vmatpush3.xpose.msk.msra.mxu0 %vm161_vm13, %v37_v44  ;;  %vm156_vm8 = vcmp.ne.s32.totalorder %v140_v9, 0  ;;  %v73_v18 = vpack.c.b16 %v55_v13, %v55_v13  ;;  %v54_v19 = vunpack.c.1.s8 %v49_v63  ;;  %v138_v21 = vunpack.c.0.s8 %v122_v16  ;;  %v298_v44 = vld [vmem:[%s515_s3] ss:$0 sm:$0xff] }
  0x1c   :  { %324 = vmatprep.subr.mxu0 %v377_v1  ;;  %vm105_vm9 = vnez %v78_v11  ;;  %v76_v17 = vpack.c.b8 %v75_v12, %v75_v12  ;;  %vm155_vm10 = vcmp.ne.s32.totalorder %v139_v15, 0  ;;  %v53_v25 = vunpack.c.0.s8 %v49_v63 }
  0x1d   :  { %v121_v22 = vsel %vm105_vm9, 16843009, %v379_v2  ;;  %v74_v23 = vpack.c.b8 %v73_v18, %v73_v18  ;;  %v71_v24 = vpack.c.b16 %v54_v19, %v54_v19  ;;  %vm154_vm12 = vcmp.ne.s32.totalorder %v138_v21, 0 }
  0x1e   :  { %vm104_vm11 = vnez %v76_v17  ;;  %v137_v27 = vunpack.c.0.s8 %v121_v22  ;;  %v69_v30 = vpack.c.b16 %v53_v25, %v53_v25 }
  0x1f   :  { %325 = vmatpush3.xpose.msk.msra.mxu0 %vm160_vm15, %v36_v50  ;;  %v120_v28 = vsel %vm104_vm11, 16843009, %v379_v2  ;;  %vm103_vm13 = vnez %v74_v23  ;;  %v72_v29 = vpack.c.b8 %v71_v24, %v71_v24 }
  0x20   :  { %326 = vmatprep.subr.mxu0 %v377_v1  ;;  %vm153_vm14 = vcmp.ne.s32.totalorder %v137_v27, 0  ;;  %v136_v32 = vunpack.c.0.s8 %v120_v28  ;;  %v119_v33 = vsel %vm103_vm13, 16843009, %v379_v2  ;;  %v70_v34 = vpack.c.b8 %v69_v30, %v69_v30 }
  0x21   :  { %vm102_vm15 = vnez %v72_v29  ;;  %v135_v36 = vunpack.c.0.s8 %v119_v33 }
  0x22   :  { %vm152_vm0 = vcmp.ne.s32.totalorder %v136_v32, 0  ;;  %v118_v37 = vsel %vm102_vm15, 16843009, %v379_v2 }
  0x23   :  { %327 = vmatpush3.xpose.msk.msra.mxu0 %vm159_vm1, %v35_v57  ;;  %vm101_vm1 = vnez %v70_v34  ;;  %vm151_vm2 = vcmp.ne.s32.totalorder %v135_v36, 0  ;;  %v134_v39 = vunpack.c.0.s8 %v118_v37 }
  0x24   :  { %328 = vmatprep.subr.mxu0 %v377_v1  ;;  %v117_v40 = vsel %vm101_vm1, 16843009, %v379_v2  ;;  %v182_v2 = vld [vmem:[%s512_s0] sm:$0xff] }
  0x25   :  { %vm150_vm3 = vcmp.ne.s32.totalorder %v134_v39, 0  ;;  %v133_v42 = vunpack.c.0.s8 %v117_v40 }
  0x27   :  { %329 = vmatpush3.xpose.msk.msra.mxu0 %vm158_vm4, %v34_v0  ;;  %vm149_vm4 = vcmp.ne.s32.totalorder %v133_v42, 0 }
  0x28   :  { %330 = vmatprep.subr.mxu0 %v377_v1 }
  0x2b   :  { %331 = vmatpush3.xpose.msk.msra.mxu0 %vm157_vm6, %v33_v8 }
  0x2c   :  { %332 = vmatprep.subr.mxu0 %v377_v1 }
  0x2f   :  { %333 = vmatpush3.xpose.msk.msra.mxu0 %vm156_vm8, %v32_v14 }
  0x30   :  { %334 = vmatprep.subr.mxu0 %v377_v1 }
  0x33   :  { %335 = vmatpush3.xpose.msk.msra.mxu0 %vm155_vm10, %v31_v20 }
  0x34   :  { %336 = vmatprep.subr.mxu0 %v377_v1 }
  0x37   :  { %337 = vmatpush3.xpose.msk.msra.mxu0 %vm154_vm12, %v30_v26 }
  0x38   :  { %338 = vmatprep.subr.mxu0 %v377_v1 }
  0x3b   :  { %339 = vmatpush3.xpose.msk.msra.mxu0 %vm153_vm14, %v29_v31 }
  0x3c   :  { %340 = vmatprep.subr.mxu0 %v377_v1 }
  0x3f   :  { %341 = vmatpush3.xpose.msk.msra.mxu0 %vm152_vm0, %v28_v35 }
  0x40   :  { %342 = vmatprep.subr.mxu0 %v377_v1 }
  0x43   :  { %343 = vmatpush3.xpose.msk.msra.mxu0 %vm151_vm2, %v27_v38 }
  0x44   :  { %344 = vmatprep.subr.mxu0 %v377_v1 }
  0x47   :  { %345 = vmatpush3.xpose.msk.msra.mxu0 %vm150_vm3, %v26_v41 }
  0x48   :  { %346 = vmatprep.subr.mxu0 %v377_v1 }
  0x4b   :  { %347 = vmatpush3.xpose.msk.msra.mxu0 %vm149_vm4, %v25_v43 }
  0x4e   :  { %349 = vmatmul.mubr.f32.vlgmr.msra.gmra.mxu0 %v182_v2 }
 0x10e   :  { %v249_v45 = vpop.f32.mrf.mxu0 }
 0x10f   :  { %v266_v46 = vadd.f32 %v298_v44, %v249_v45 }
 0x110   :  { %v350_v1 = vpop.f32.mrf.mxu0 }
 0x111   :  { %267 = vst [vmem:[#allocation3] sm:$0xff] %v266_v46 }
 0x112   :  { %366 = shalt.err (!%p363_p4)
}
 0x113   :  { %277 = dma.vmem_to_hbm [thread:$0]  %s275_s7, 128, %s516_s4, [#allocation4]  }
 0x114   :  { %375 = dma.done.wait [#allocation4], 128  }
 0x115   :  { %376 = vsyncadd [#allocation4], 4294967168 }
 0x116   :  { %281 = vsyncpa [#allocation4], 1 }

</bundles_post_ra>
